<compile_context>
chip_gen: v5e
topology: v5e:2x2
jax: 0.10.0
libtpu: 0.0.40
codegen_flags: <defaults>
</compile_context>

<pallas_src>
import functools

import jax
import jax.numpy as jnp
from jax.experimental import pallas as pl
from jax.experimental.pallas import tpu as pltpu

EPS = 1e-05


def _round_up(x, m):
    return (x + m - 1) // m * m


def _pick_h_chunk(H, th):
    """Largest 128-aligned divisor of H that is <= th (falls back to full H)."""
    th = min(th, H)
    if H % 128 == 0:
        th = max((th // 128) * 128, 128)
        while H % th != 0:
            th -= 128
        return th
    # Non-lane-aligned H only shows up at toy sizes; keep the whole thing.
    # TODO(synk): for odd H at production scale, zero-pad H in prepare_weights.
    return H


def idefics_mlp_kernel(x_ref, lnp_ref, fcw_ref, cpw_ref, o_ref,
                       xn_ref, acc_ref=None, *, th, resident):
    # x_ref:   (tm, D)            row tile of flattened hidden_states
    # lnp_ref: (2, D)             packed LayerNorm [weight; bias] (f32, constant)
    # fcw_ref: (D, th) | (D, H)   fc weight slab / full VMEM-resident weight
    # cpw_ref: (th, D) | (H, D)   c_proj weight slab / full VMEM-resident weight
    # o_ref:   (tm, D)            output tile (same block across H axis -> resident)
    # xn_ref:  (tm, D)            scratch: LayerNorm(x) cached in weight dtype
    # acc_ref: (tm, D)            optional f32 scratch (omitted when o_ref is f32)
    h_idx = pl.program_id(1)
    acc = o_ref if acc_ref is None else acc_ref

    @pl.when(h_idx == 0)
    def _():
        # LayerNorm in f32 (biased variance, eps inside rsqrt == nn.LayerNorm).
        x = x_ref[...].astype(jnp.float32)
        mean = jnp.mean(x, axis=-1, keepdims=True)
        centered = x - mean
        var = jnp.mean(centered * centered, axis=-1, keepdims=True)
        ln = lnp_ref[...].astype(jnp.float32)
        xn = centered * jax.lax.rsqrt(var + EPS) * ln[0:1, :] + ln[1:2, :]
        xn_ref[...] = xn.astype(xn_ref.dtype)          # cast to weight dtype once

    if resident:                                        # static branch
        off = pl.multiple_of(h_idx * th, th)
        fcw = fcw_ref[:, pl.ds(off, th)]
        cpw = cpw_ref[pl.ds(off, th), :]
    else:
        fcw = fcw_ref[...]
        cpw = cpw_ref[...]

    # fc chunk (no bias) + ReLU, f32 accumulation on the MXU.
    hid = jnp.dot(xn_ref[...], fcw, preferred_element_type=jnp.float32)
    hid = jnp.maximum(hid, 0.0)
    # c_proj chunk (no bias), partial sum over this H chunk.
    part = jnp.dot(hid.astype(cpw.dtype), cpw, preferred_element_type=jnp.float32)

    @pl.when(h_idx == 0)
    def _():
        acc[...] = part.astype(acc.dtype)               # direct write, no zero-init RMW

    @pl.when(h_idx > 0)
    def _():
        acc[...] += part.astype(acc.dtype)

    if acc_ref is not None:                             # static branch
        @pl.when(h_idx == pl.num_programs(1) - 1)
        def _():
            o_ref[...] = acc_ref[...].astype(o_ref.dtype)


def prepare_weights(fc_w, c_proj_w, dtype=jnp.bfloat16):
    """One-time layout / dtype prep (do at weight-load time, not per call).

    fc_w:     (H, D) PyTorch layout -> (D, H)
    c_proj_w: (D, H) PyTorch layout -> (H, D)
    dtype:    target weight dtype; bf16 is the production default (halves HBM
              traffic + fast MXU path).  Pass None to keep the input dtype.
    """
    fc_t = jnp.asarray(fc_w).T
    cp_t = jnp.asarray(c_proj_w).T
    if dtype is not None:
        fc_t = fc_t.astype(dtype)
        cp_t = cp_t.astype(dtype)
    return fc_t, cp_t


@functools.partial(jax.jit, static_argnames=("tm", "th", "weights_resident"))
def idefics_mlp(hidden_states, ln_w, ln_b, fc_w_t, c_proj_w_t, *,
                tm=512, th=1280, weights_resident=None):
    """hidden_states: (B, S, D).  fc_w_t: (D, H), c_proj_w_t: (H, D) (pre-transposed)."""
    B, S, D = hidden_states.shape
    H = fc_w_t.shape[1]
    M = B * S
    out_dtype = hidden_states.dtype
    w_dtype = fc_w_t.dtype

    # ---- Row tiling: balanced tiles, minimal padding; give the "parallel" axis
    #      >= 2 tiles when there is enough work so both v7x TensorCores are fed.
    n_rows = max(1, pl.cdiv(M, tm))
    if n_rows == 1 and M >= 256:
        n_rows = 2
    tm_eff = min(_round_up(pl.cdiv(M, n_rows), 8), _round_up(M, 8))
    M_pad = tm_eff * n_rows

    # ---- Intermediate-dim chunking (lane-aligned divisor of H, no full-H fallback
    #      for lane-aligned H -> no latent VMEM blowup on v7x).
    th_eff = _pick_h_chunk(H, th)
    n_h = H // th_eff

    # ---- Weights resident in VMEM?  (DMA'd once per call instead of per row tile.)
    w_bytes = (fc_w_t.size + c_proj_w_t.size) * w_dtype.itemsize
    if weights_resident is None:
        weights_resident = (n_rows >= 2) and (w_bytes <= 28 * 1024 * 1024)

    x2d = hidden_states.reshape(M, D)
    if M_pad != M:
        # Zero rows are safe through LayerNorm (rsqrt(0 + eps)) and sliced off below.
        x2d = jnp.pad(x2d, ((0, M_pad - M), (0, 0)))
    lnp = jnp.stack([ln_w, ln_b]).astype(jnp.float32)        # (2, D) packed LN params

    if weights_resident:
        fcw_spec = pl.BlockSpec((D, H), lambda i, h: (0, 0),
                                pipeline_mode=pl.Buffered(1))
        cpw_spec = pl.BlockSpec((H, D), lambda i, h: (0, 0),
                                pipeline_mode=pl.Buffered(1))
        w_vmem = 2 * D * H * w_dtype.itemsize                # single-buffered, full
    else:
        fcw_spec = pl.BlockSpec((D, th_eff), lambda i, h: (0, h))
        cpw_spec = pl.BlockSpec((th_eff, D), lambda i, h: (h, 0))
        w_vmem = 2 * 2 * D * th_eff * w_dtype.itemsize       # double-buffered slabs

    acc_in_out = (out_dtype == jnp.float32)
    scratch_shapes = [pltpu.VMEM((tm_eff, D), w_dtype)]      # cached LayerNorm(x)
    if not acc_in_out:
        scratch_shapes.append(pltpu.VMEM((tm_eff, D), jnp.float32))

    # Explicit VMEM budget: the 32 MiB scoped default is too small once tm/th
    # are raised or weights are resident; clamp well below v5e/v6e physical.
    est = (2 * tm_eff * D * out_dtype.itemsize               # x tile (double-buffered)
           + 2 * tm_eff * D * out_dtype.itemsize             # out tile
           + 2 * 2 * D * 4                                   # LN params
           + w_vmem
           + tm_eff * D * w_dtype.itemsize                   # xn scratch
           + (0 if acc_in_out else tm_eff * D * 4))          # f32 accumulator
    vmem_limit = int(min(max(est * 1.25 + (2 << 20), 32 << 20), 100 << 20))

    kernel = functools.partial(idefics_mlp_kernel, th=th_eff,
                               resident=weights_resident)

    out = pl.pallas_call(
        kernel,
        out_shape=jax.ShapeDtypeStruct((M_pad, D), out_dtype),
        grid_spec=pltpu.PrefetchScalarGridSpec(
            num_scalar_prefetch=0,
            grid=(n_rows, n_h),
            in_specs=[
                pl.BlockSpec((tm_eff, D), lambda i, h: (i, 0)),   # x row tile
                pl.BlockSpec((2, D), lambda i, h: (0, 0)),        # LN weight+bias
                fcw_spec,                                         # fc weight
                cpw_spec,                                         # c_proj weight
            ],
            out_specs=pl.BlockSpec((tm_eff, D), lambda i, h: (i, 0)),
            scratch_shapes=scratch_shapes,
        ),
        compiler_params=pltpu.CompilerParams(
            dimension_semantics=("parallel", "arbitrary"),
            vmem_limit_bytes=vmem_limit),
    )(x2d, lnp, fc_w_t, c_proj_w_t)

    if M_pad != M:
        out = out[:M]
    return out.reshape(B, S, D)


def reference_mlp(hidden_states, ln_w, ln_b, fc_w, c_proj_w):
    x = hidden_states.astype(jnp.float32)
    mean = jnp.mean(x, axis=-1, keepdims=True)
    var = jnp.mean((x - mean) ** 2, axis=-1, keepdims=True)
    xn = (x - mean) / jnp.sqrt(var + EPS) * ln_w + ln_b
    h = jnp.maximum(xn @ fc_w.T.astype(jnp.float32), 0.0)
    return h @ c_proj_w.T.astype(jnp.float32)


if __name__ == "__main__":
    # Small shapes consistent with the module (embed_dim D, intermediate H),
    # lane-dense (D % 128 == 0); small th values force multiple H chunks so the
    # accumulation / resident-slicing paths are exercised.
    B, S, D, H = 2, 8, 128, 1024

    key = jax.random.PRNGKey(0)
    k_x, k_lnw, k_lnb, k_fc, k_cp = jax.random.split(key, 5)

    hidden_states = jax.random.normal(k_x, (B, S, D), dtype=jnp.float32)
    ln_w = jax.random.normal(k_lnw, (D,), dtype=jnp.float32) * 0.1 + 1.0
    ln_b = jax.random.normal(k_lnb, (D,), dtype=jnp.float32) * 0.1
    fc_w = jax.random.normal(k_fc, (H, D), dtype=jnp.float32) * (1.0 / D ** 0.5)
    c_proj_w = jax.random.normal(k_cp, (D, H), dtype=jnp.float32) * (1.0 / H ** 0.5)

    ref = reference_mlp(hidden_states, ln_w, ln_b, fc_w, c_proj_w)

    # 1) f32-weight path (tight tolerance), H streamed in slabs, acc lives in o_ref.
    fcw_f32, cpw_f32 = prepare_weights(fc_w, c_proj_w, dtype=None)
    out = jax.block_until_ready(
        idefics_mlp(hidden_states, ln_w, ln_b, fcw_f32, cpw_f32,
                    th=256, weights_resident=False))
    assert out.shape == (B, S, D)
    assert jnp.allclose(out, ref, atol=2e-3, rtol=2e-3), "f32 mismatch vs reference"

    # 2) Production path: bf16 weights, VMEM-resident, sliced per H chunk.
    fcw_bf, cpw_bf = prepare_weights(fc_w, c_proj_w)          # bf16 default
    out_res = jax.block_until_ready(
        idefics_mlp(hidden_states, ln_w, ln_b, fcw_bf, cpw_bf,
                    th=256, weights_resident=True))
    assert jnp.allclose(out_res, ref, atol=5e-2, rtol=5e-2), \
        "bf16 resident-weight mismatch vs reference"

    # 3) bf16 activations + bf16 weights, streamed slabs (f32 acc-scratch path).
    hs_bf = hidden_states.astype(jnp.bfloat16)
    ref_bf = reference_mlp(hs_bf.astype(jnp.float32), ln_w, ln_b, fc_w, c_proj_w)
    out_bf = jax.block_until_ready(
        idefics_mlp(hs_bf, ln_w, ln_b, fcw_bf, cpw_bf,
                    th=512, weights_resident=False))
    assert out_bf.dtype == jnp.bfloat16
    assert jnp.allclose(out_bf.astype(jnp.float32), ref_bf, atol=1e-1, rtol=1e-1), \
        "bf16 activation mismatch vs reference"

    print("KERNEL_OK")
</pallas_src>

<mosaic_0001>
module attributes {stable_mosaic.version = 11 : i64} {
  func.func @idefics_mlp_kernel(%arg0: i32, %arg1: i32, %arg2: memref<16x128xf32, #tpu.memory_space<vmem>>, %arg3: memref<2x128xf32, #tpu.memory_space<vmem>>, %arg4: memref<128x256xf32, #tpu.memory_space<vmem>>, %arg5: memref<256x128xf32, #tpu.memory_space<vmem>>, %arg6: memref<16x128xf32, #tpu.memory_space<vmem>>, %arg7: memref<16x128xf32, #tpu.memory_space<vmem>>) attributes {dimension_semantics = [#tpu.dimension_semantics<parallel>, #tpu.dimension_semantics<arbitrary>], iteration_bounds = array<i64: 1, 4>, scalar_prefetch = 0 : i64, scratch_operands = 1 : i64, tpu.core_type = #tpu.core_type<tc>, window_params = [{transform_indices = @transform_0, window_bounds = array<i64: 16, 128>}, {pipeline_mode = #tpu.pipeline_mode<synchronous>, transform_indices = @transform_1, window_bounds = array<i64: 2, 128>}, {transform_indices = @transform_2, window_bounds = array<i64: 128, 256>}, {transform_indices = @transform_3, window_bounds = array<i64: 256, 128>}, {transform_indices = @transform_4, window_bounds = array<i64: 16, 128>}]} {
    %c0_i32 = arith.constant 0 : i32
    %0 = arith.cmpi eq, %arg1, %c0_i32 : i32
    %1 = arith.extui %0 : i1 to i32
    %c0_i32_0 = arith.constant 0 : i32
    %2 = arith.cmpi ne, %1, %c0_i32_0 : i32
    scf.if %2 {
      %c0_12 = arith.constant 0 : index
      %c0_13 = arith.constant 0 : index
      %16 = vector.load %arg2[%c0_12, %c0_13] : memref<16x128xf32, #tpu.memory_space<vmem>>, vector<16x128xf32>
      %cst_14 = arith.constant dense<0.000000e+00> : vector<16xf32>
      %17 = vector.multi_reduction <add>, %16, %cst_14 [1] : vector<16x128xf32> to vector<16xf32>
      %18 = vector.shape_cast %17 : vector<16xf32> to vector<16x1xf32>
      %cst_15 = arith.constant 1.280000e+02 : f32
      %19 = vector.broadcast %cst_15 : f32 to vector<16x1xf32>
      %20 = arith.divf %18, %19 : vector<16x1xf32>
      %21 = vector.broadcast %20 : vector<16x1xf32> to vector<16x128xf32>
      %22 = arith.subf %16, %21 : vector<16x128xf32>
      %23 = arith.mulf %22, %22 : vector<16x128xf32>
      %cst_16 = arith.constant dense<0.000000e+00> : vector<16xf32>
      %24 = vector.multi_reduction <add>, %23, %cst_16 [1] : vector<16x128xf32> to vector<16xf32>
      %25 = vector.shape_cast %24 : vector<16xf32> to vector<16x1xf32>
      %cst_17 = arith.constant 1.280000e+02 : f32
      %26 = vector.broadcast %cst_17 : f32 to vector<16x1xf32>
      %27 = arith.divf %25, %26 : vector<16x1xf32>
      %c0_18 = arith.constant 0 : index
      %c0_19 = arith.constant 0 : index
      %28 = vector.load %arg3[%c0_18, %c0_19] : memref<2x128xf32, #tpu.memory_space<vmem>>, vector<2x128xf32>
      %cst_20 = arith.constant 9.99999974E-6 : f32
      %29 = vector.broadcast %cst_20 : f32 to vector<16x1xf32>
      %30 = arith.addf %27, %29 : vector<16x1xf32>
      %31 = math.rsqrt %30 : vector<16x1xf32>
      %32 = vector.broadcast %31 : vector<16x1xf32> to vector<16x128xf32>
      %33 = arith.mulf %22, %32 : vector<16x128xf32>
      %34 = vector.extract_strided_slice %28 {offsets = [0, 0], sizes = [1, 128], strides = [1, 1]} : vector<2x128xf32> to vector<1x128xf32>
      %35 = vector.broadcast %34 : vector<1x128xf32> to vector<16x128xf32>
      %36 = arith.mulf %33, %35 : vector<16x128xf32>
      %37 = vector.extract_strided_slice %28 {offsets = [1, 0], sizes = [1, 128], strides = [1, 1]} : vector<2x128xf32> to vector<1x128xf32>
      %38 = vector.broadcast %37 : vector<1x128xf32> to vector<16x128xf32>
      %39 = arith.addf %36, %38 : vector<16x128xf32>
      %c0_21 = arith.constant 0 : index
      %c0_22 = arith.constant 0 : index
      %40 = vector.load %arg7[%c0_21, %c0_22] : memref<16x128xf32, #tpu.memory_space<vmem>>, vector<16x128xf32>
      tpu.vector_store %arg7[%c0_21, %c0_22], %39 {strides = array<i32>} : memref<16x128xf32, #tpu.memory_space<vmem>>, vector<16x128xf32>,
    } else {
    }
    %c0 = arith.constant 0 : index
    %c0_1 = arith.constant 0 : index
    %3 = vector.load %arg4[%c0, %c0_1] : memref<128x256xf32, #tpu.memory_space<vmem>>, vector<128x256xf32>
    %c0_2 = arith.constant 0 : index
    %c0_3 = arith.constant 0 : index
    %4 = vector.load %arg5[%c0_2, %c0_3] : memref<256x128xf32, #tpu.memory_space<vmem>>, vector<256x128xf32>
    %c0_4 = arith.constant 0 : index
    %c0_5 = arith.constant 0 : index
    %5 = vector.load %arg7[%c0_4, %c0_5] : memref<16x128xf32, #tpu.memory_space<vmem>>, vector<16x128xf32>
    %cst = arith.constant dense<0.000000e+00> : vector<16x256xf32>
    %6 = tpu.matmul %5, %3, %cst {dimension_numbers = #tpu.dot_dimension_numbers<[1], [0], [0], [1], [0, 0, 1, 1], [], []>} : vector<16x128xf32>, vector<128x256xf32>, vector<16x256xf32> -> vector<16x256xf32>
    %cst_6 = arith.constant 0.000000e+00 : f32
    %7 = vector.broadcast %cst_6 : f32 to vector<16x256xf32>
    %8 = arith.maximumf %6, %7 : vector<16x256xf32>
    %cst_7 = arith.constant dense<0.000000e+00> : vector<16x128xf32>
    %9 = tpu.matmul %8, %4, %cst_7 {dimension_numbers = #tpu.dot_dimension_numbers<[1], [0], [0], [1], [0, 0, 1, 1], [], []>} : vector<16x256xf32>, vector<256x128xf32>, vector<16x128xf32> -> vector<16x128xf32>
    %c0_i32_8 = arith.constant 0 : i32
    %10 = arith.cmpi eq, %arg1, %c0_i32_8 : i32
    %11 = arith.extui %10 : i1 to i32
    %c0_i32_9 = arith.constant 0 : i32
    %12 = arith.cmpi ne, %11, %c0_i32_9 : i32
    scf.if %12 {
      %c0_12 = arith.constant 0 : index
      %c0_13 = arith.constant 0 : index
      %16 = vector.load %arg6[%c0_12, %c0_13] : memref<16x128xf32, #tpu.memory_space<vmem>>, vector<16x128xf32>
      tpu.vector_store %arg6[%c0_12, %c0_13], %9 {strides = array<i32>} : memref<16x128xf32, #tpu.memory_space<vmem>>, vector<16x128xf32>,
    } else {
    }
    %c0_i32_10 = arith.constant 0 : i32
    %13 = arith.cmpi sgt, %arg1, %c0_i32_10 : i32
    %14 = arith.extui %13 : i1 to i32
    %c0_i32_11 = arith.constant 0 : i32
    %15 = arith.cmpi ne, %14, %c0_i32_11 : i32
    scf.if %15 {
      %c0_12 = arith.constant 0 : index
      %c0_13 = arith.constant 0 : index
      %16 = vector.load %arg6[%c0_12, %c0_13] : memref<16x128xf32, #tpu.memory_space<vmem>>, vector<16x128xf32>
      %17 = arith.addf %16, %9 : vector<16x128xf32>
      %c0_14 = arith.constant 0 : index
      %c0_15 = arith.constant 0 : index
      %18 = vector.load %arg6[%c0_14, %c0_15] : memref<16x128xf32, #tpu.memory_space<vmem>>, vector<16x128xf32>
      tpu.vector_store %arg6[%c0_14, %c0_15], %17 {strides = array<i32>} : memref<16x128xf32, #tpu.memory_space<vmem>>, vector<16x128xf32>,
    } else {
    }
    return
  }
  func.func @transform_0(%arg0: i32, %arg1: i32) -> (i32, i32) {
    %c0_i32 = arith.constant 0 : i32
    %c0_i32_0 = arith.constant 0 : i32
    return %arg0, %c0_i32 : i32, i32
  }
  func.func @transform_1(%arg0: i32, %arg1: i32) -> (i32, i32) {
    %c0_i32 = arith.constant 0 : i32
    %c0_i32_0 = arith.constant 0 : i32
    %c0_i32_1 = arith.constant 0 : i32
    return %c0_i32, %c0_i32_0 : i32, i32
  }
  func.func @transform_2(%arg0: i32, %arg1: i32) -> (i32, i32) {
    %c0_i32 = arith.constant 0 : i32
    %c0_i32_0 = arith.constant 0 : i32
    return %c0_i32, %arg1 : i32, i32
  }
  func.func @transform_3(%arg0: i32, %arg1: i32) -> (i32, i32) {
    %c0_i32 = arith.constant 0 : i32
    %c0_i32_0 = arith.constant 0 : i32
    return %arg1, %c0_i32 : i32, i32
  }
  func.func @transform_4(%arg0: i32, %arg1: i32) -> (i32, i32) {
    %c0_i32 = arith.constant 0 : i32
    %c0_i32_0 = arith.constant 0 : i32
    return %arg0, %c0_i32 : i32, i32
  }
}

</mosaic_0001>

<bundles_post_ra>
// kernel: idefics_mlp.1
= control target key start
LH: loop header
LB: loop body
LE: loop exit
PB: predicated region body
PF: predicated region fallthrough
CT: control target
= control target key end

     0   :  { %9 = vsyncpa [#allocation4], 0  ;;  %s1180_s0 = inlined_call_operand.hbm [shape: f32[16,128], index: 0, kind: input, shape index: {}]   ;;  %s1181_s1 = inlined_call_operand.vmem [shape: f32[2,128], index: 1, kind: input, shape index: {}]   ;;  %s1182_s2 = inlined_call_operand.hbm [shape: f32[128,1024], index: 2, kind: input, shape index: {}]   ;;  %s1183_s3 = inlined_call_operand.hbm [shape: f32[1024,128], index: 3, kind: input, shape index: {}]   ;;  %s1184_s4 = inlined_call_operand.hbm [shape: f32[16,128], index: 4, kind: output, shape index: {}]  }
   0x1   :  { %10 = vsyncpa [#allocation7], 0 }
   0x2   :  { %12 = vsyncpa [#allocation7 + $0x1], 0 }
   0x3   :  { %13 = vsyncpa [#allocation5], 0  ;;  %s967_s15 = smov 0   ;;  %s969_s16 = smov 0  }
   0x4   :  { %s971_s17 = smov 0   ;;  %s973_s18 = smov 0  }
   0x5   :  { %s975_s19 = smov 0   ;;  %s977_s20 = smov 0  }
   0x6 LB: > { %s28_s21 = sadd.s32 1, %s926_s19  ;;  %s85_s22 = sadd.s32 1, %s918_s17  ;;  %s930_s20 = sphi %s977_s20, %s19_s20   ;;  %s926_s19 = sphi %s975_s19, %s1193_s19   ;;  %s922_s18 = sphi %s973_s18, %s1192_s18   ;;  %s918_s17 = sphi %s971_s17, %s1191_s17   ;;  %s914_s16 = sphi %s969_s16, %s1190_s16   ;;  %s910_s15 = sphi %s967_s15, %s1189_s15  }
   0x7   : > { %p29_p0 = scmp.ge.s32.totalorder %s28_s21, 4  ;;  %p92_p1 = scmp.ne.s32.totalorder %s918_s17, %s914_s16 }
   0x8   : > { %p93_p2 = scmp.eq.s32.totalorder %s930_s20, 0  ;;  %p686_p4 = scmp.lt.s32.totalorder %s930_s20, 4 }
   0x9   : > { %s1195_s21 = smov (%p29_p0, %s28_s21), 0  ;;  %s194_s25 = sand.u32 1, %s930_s20  }
   0xa   : > { %p1004_p3 = por %p93_p2, %p92_p1  ;;  %s82_s24 = ssub.s32 %s926_s19, %s1195_s21 }
   0xb   : > { %p83_p5 = scmp.eq.s32.totalorder %s82_s24, 0  ;;  %s196_s26 = sand.u32 1, %s918_s17  }
   0xc   : > { %s660_s27 = sshll.u32 %s926_s19, 4  ;;  %s1017_s29 = sshll.u32 %s196_s26, 8 }
   0xd   : > { %s1015_s28 = scalar_select %p83_p5, %s918_s17, %s85_s22  }
   0xe   : > { %s203_s6 = scalar_lea.hbm %s1182_s2, %s660_s27  ;;  %s198_s8 = scalar_lea.vmem [#allocation6], %s1017_s29 }
   0xf   : > { %s204_s7 = sshll.u32 %s203_s6, 4  ;;  %s206_s9 = sshll.u32 %s198_s8, 4  ;;  %s205_s7 = int_to_ptr.hbm [resolvable:$true] %s204_s7  ;;  %s207_s9 = int_to_ptr.vmem [resolvable:$true] %s206_s9 }
  0x10   : > { %p1027_p6 = pnand %p686_p4, %p1004_p3  ;;  %s1031_s11 = scalar_lea.sflag [#allocation7], %s194_s25 }
  0x11   : > { %s932_s12 = smov 1024   ;;  %s933_s13 = smov 256  }
  0x12   : > { %s934_s14 = smov 16   ;;  %s1037_s22 = sadd.s32 4294967295, %s930_s20  }
  0x13   : > { %681 = dma.hbm_to_vmem [thread:$0]  (!%p1027_p6), %s205_s7, 4096, %s207_s9, %s1031_s11, %s932_s12, %s933_s13, %s934_s14  }
  0x14   : > { %p98_p7 = scmp.ne.s32.totalorder %s914_s16, %s910_s15  ;;  %p99_p8 = scmp.eq.s32.totalorder %s1037_s22, 0 }
  0x15   : > { %p640_p9 = scmp.ge.s32.totalorder %s930_s20, 1  ;;  %p161_p10 = scmp.lt.s32.totalorder %s930_s20, 5 }
  0x16   : > { %p1046_p11 = por %p99_p8, %p98_p7  ;;  %s175_s26 = sshll.u32 %s1180_s0, 4  ;;  %s176_s26 = int_to_ptr.hbm [resolvable:$true] %s175_s26 }
  0x17   : > { %p1053_p12 = pnand %p640_p9, %p161_p10  ;;  %s935_s15 = smov [#allocation3]  }
  0x18   : > { %s177_s30 = sshll.u32 %s935_s15, 4  ;;  %s661_s5 = sshll.u32 %s926_s19, 8  ;;  %s178_s30 = int_to_ptr.vmem [resolvable:$true] %s177_s30 }
  0x19   : > { %p674_p13 = pneg %p1053_p12  ;;  %s220_s6 = scalar_lea.vmem [#allocation8], %s1017_s29 }
  0x1a   : > { %s228_s7 = sshll.u32 %s220_s6, 4  ;;  %s225_s12 = scalar_lea.hbm %s1183_s3, %s661_s5  ;;  %s229_s7 = int_to_ptr.vmem [resolvable:$true] %s228_s7 }
  0x1b   : > { %p675_p0 = pnand %p674_p13, %p99_p8  ;;  %s936_s13 = smov 128  }
  0x1c   : > { %s937_s14 = smov 8   ;;  %s226_s24 = sshll.u32 %s225_s12, 4  ;;  %s227_s24 = int_to_ptr.hbm [resolvable:$true] %s226_s24 }
  0x1d   : > { %677 = dma.hbm_to_vmem [thread:$0]  (!%p675_p0), %s176_s26, 256, %s178_s30, [#allocation4], %s936_s13, %s936_s13, %s937_s14  }
  0x1e   : > { %684 = dma.hbm_to_vmem [thread:$0]  (!%p1027_p6), %s227_s24, 4096, %s229_s7, %s1031_s11, %s936_s13, %s936_s13, %s937_s14  }
  0x1f   : > { %240 = sbr.rel (%p1053_p12) target bundleno = 645 (0x285), region = 36 }
  0x24   : > { %897 = dma.done.wait (%p99_p8), [#allocation4], 256  }
  0x25   : > { %899 = vsyncadd (%p99_p8), [#allocation4], 4294967040  ;;  %s247_s29 = sand.u32 1, %s1037_s22   ;;  %s249_s25 = sand.u32 1, %s914_s16  }
  0x26   : > { %s651_s26 = sshll.u32 %s249_s25, 8  ;;  %s248_s15 = scalar_lea.sflag [#allocation7], %s247_s29 }
  0x27   : > { %s1077_s30 = scalar_lea.vmem [#allocation6], %s651_s26 }
  0x28   : > { %901 = dma.done.wait (%p1046_p11), %s248_s15, 8192  }
  0x29   : > { %903 = vsyncadd (%p1046_p11), %s248_s15, 4294959104  ;;  %s1083_s10 = scalar_lea.vmem [#allocation8], %s651_s26  ;;  %p653_p1 = scmp.ne.s32.totalorder %s922_s18, 0 }
  0x2b   : > { %294 = sbr.rel (%p653_p1) target bundleno = 324 (0x144), region = 52 }
  0x30   : > { %v295_v0 = vld [vmem:[#allocation3] sm:$0xff]  ;;  %v296_v1 = vld [vmem:[#allocation3 + $0x8] sm:$0xff]  ;;  %v938_v2 = vmov 128.0   ;;  %v320_v27 = vld [vmem:[%s1181_s1] sm:$0x3] }
  0x31   : > { %297 = vadd.xlane.f32.xlu0 %v295_v0  ;;  %748 = vrcp.f32 %v938_v2  ;;  %v345_v32 = vperm.slane %v320_v27, 0  ;;  %v348_v35 = vperm.slane %v320_v27, 1 }
  0x37   : > { %v749_v3 = vpop.eup %748 }
  0x38   : > { %v302_v4 = vmul.f32 128.0, %v749_v3  ;;  %vm306_vm0 = vweird.f32 %v749_v3 }
  0x39   : > { %299 = vadd.xlane.f32.xlu0 %v296_v1 }
  0x3a   : > { %v303_v5 = vsub.f32 1.0, %v302_v4 }
  0x3c   : > { %v304_v6 = vmul.f32 %v749_v3, %v303_v5 }
  0x3e   : > { %v305_v7 = vadd.f32 %v749_v3, %v304_v6 }
  0x40   : > { %v307_v8 = vsel %vm306_vm0, %v749_v3, %v305_v7 }
  0xa4   : > { %v298_v9 = vpop.xlane.xlu0 %297 }
  0xa5   : > { %v308_v10 = vmul.f32 %v307_v8, %v298_v9 }
  0xa7   : > { %v310_v11 = vsub.f32 %v295_v0, %v308_v10 }
  0xa9   : > { %v312_v12 = vmul.f32 %v310_v11, %v310_v11 }
  0xab   : > { %314 = vadd.xlane.f32.xlu1 %v312_v12 }
  0xac   : > { %v300_v13 = vpop.xlane.xlu0 %299 }
  0xad   : > { %v309_v14 = vmul.f32 %v307_v8, %v300_v13 }
  0xaf   : > { %v311_v15 = vsub.f32 %v296_v1, %v309_v14 }
  0xb1   : > { %v313_v16 = vmul.f32 %v311_v15, %v311_v15 }
  0xb3   : > { %316 = vadd.xlane.f32.xlu1 %v313_v16 }
 0x11e   : > { %v315_v17 = vpop.xlane.xlu1 %314 }
 0x11f   : > { %v318_v18 = vmul.f32 %v315_v17, %v307_v8 }
 0x121   : > { %v321_v19 = vadd.f32 1e-05, %v318_v18 }
 0x123   : > { %750 = vrsqrt.f32 %v321_v19  ;;  %vm329_vm2 = vweird.f32 %v321_v19 }
 0x126   : > { %v317_v20 = vpop.xlane.xlu1 %316 }
 0x127   : > { %v319_v21 = vmul.f32 %v317_v20, %v307_v8 }
 0x129   : > { %v751_v22 = vpop.eup %750  ;;  %v322_v23 = vadd.f32 1e-05, %v319_v21 }
 0x12a   : > { %v324_v24 = vmul.f32 %v751_v22, %v321_v19  ;;  %vm330_vm1 = vweird.f32 %v751_v22 }
 0x12b   : > { %752 = vrsqrt.f32 %v322_v23  ;;  %vm331_vm3 = vmor %vm329_vm2, %vm330_vm1  ;;  %vm339_vm5 = vweird.f32 %v322_v23 }
 0x12c   : > { %v325_v25 = vmul.f32 %v751_v22, %v324_v24 }
 0x12e   : > { %v326_v26 = vmul.f32 0.5, %v325_v25 }
 0x130   : > { %v327_v28 = vsub.f32 1.5, %v326_v26 }
 0x131   : > { %v753_v29 = vpop.eup %752 }
 0x132   : > { %v328_v30 = vmul.f32 %v751_v22, %v327_v28  ;;  %v334_v31 = vmul.f32 %v753_v29, %v322_v23  ;;  %vm340_vm4 = vweird.f32 %v753_v29 }
 0x133   : > { %vm341_vm6 = vmor %vm339_vm5, %vm340_vm4 }
 0x134   : > { %v332_v33 = vsel %vm331_vm3, %v751_v22, %v328_v30  ;;  %v335_v34 = vmul.f32 %v753_v29, %v334_v31 }
 0x135   : > { %v343_v36 = vmul.f32 %v332_v33, %v310_v11 }
 0x136   : > { %v336_v37 = vmul.f32 0.5, %v335_v34 }
 0x137   : > { %v346_v38 = vmul.f32 %v345_v32, %v343_v36 }
 0x138   : > { %v337_v39 = vsub.f32 1.5, %v336_v37 }
 0x139   : > { %v349_v40 = vadd.f32 %v348_v35, %v346_v38 }
 0x13a   : > { %v338_v41 = vmul.f32 %v753_v29, %v337_v39 }
 0x13b   : > { %351 = vst [vmem:[#allocation2] sm:$0xff] %v349_v40 }
 0x13c   : > { %v342_v42 = vsel %vm341_vm6, %v753_v29, %v338_v41 }
 0x13d   : > { %v344_v43 = vmul.f32 %v342_v42, %v311_v15 }
 0x13f   : > { %v347_v44 = vmul.f32 %v345_v32, %v344_v43 }
 0x141   : > { %v350_v45 = vadd.f32 %v348_v35, %v347_v44 }
 0x143   : > { %352 = vst [vmem:[#allocation2 + $0x8] sm:$0xff] %v350_v45 }
 0x144 PF: > { %v383_v46 = vld [vmem:[%s1077_s30 + $0xf0] sm:$0xff]  ;;  %v384_v47 = vld [vmem:[%s1077_s30 + $0xf8] sm:$0xff]  ;;  %v381_v48 = vld [vmem:[%s1077_s30 + $0xe0] sm:$0xff] }
 0x145   : > { %419 = vmatpush.msra.mxu0 %v383_v46  ;;  %442 = vmatpush.msra.mxu1 %v384_v47  ;;  %v382_v49 = vld [vmem:[%s1077_s30 + $0xe8] sm:$0xff]  ;;  %v379_v50 = vld [vmem:[%s1077_s30 + $0xd0] sm:$0xff]  ;;  %v380_v51 = vld [vmem:[%s1077_s30 + $0xd8] sm:$0xff] }
 0x146   : > { %v377_v52 = vld [vmem:[%s1077_s30 + $0xc0] sm:$0xff]  ;;  %v378_v53 = vld [vmem:[%s1077_s30 + $0xc8] sm:$0xff]  ;;  %v375_v54 = vld [vmem:[%s1077_s30 + $0xb0] sm:$0xff] }
 0x147   : > { %420 = vmatpush.msra.mxu0 %v381_v48  ;;  %443 = vmatpush.msra.mxu1 %v382_v49  ;;  %v376_v55 = vld [vmem:[%s1077_s30 + $0xb8] sm:$0xff]  ;;  %v373_v56 = vld [vmem:[%s1077_s30 + $0xa0] sm:$0xff]  ;;  %v374_v57 = vld [vmem:[%s1077_s30 + $0xa8] sm:$0xff] }
 0x148   : > { %v371_v58 = vld [vmem:[%s1077_s30 + $0x90] sm:$0xff]  ;;  %v372_v59 = vld [vmem:[%s1077_s30 + $0x98] sm:$0xff]  ;;  %v369_v60 = vld [vmem:[%s1077_s30 + $0x80] sm:$0xff] }
 0x149   : > { %421 = vmatpush.msra.mxu0 %v379_v50  ;;  %444 = vmatpush.msra.mxu1 %v380_v51  ;;  %v400_v61 = vld [vmem:[%s1083_s10 + $0x78] sm:$0xff]  ;;  %v370_v63 = vld [vmem:[%s1077_s30 + $0x88] sm:$0xff]  ;;  %v399_v0 = vld [vmem:[%s1083_s10 + $0x70] sm:$0xff] }
 0x14a   : > { %v416_v62 = vld [vmem:[%s1083_s10 + $0xf8] sm:$0xff]  ;;  %469 = vmatpush.msra.mxu2 %v400_v61  ;;  %v415_v1 = vld [vmem:[%s1083_s10 + $0xf0] sm:$0xff]  ;;  %v398_v2 = vld [vmem:[%s1083_s10 + $0x68] sm:$0xff] }
 0x14b   : > { %422 = vmatpush.msra.mxu0 %v377_v52  ;;  %445 = vmatpush.msra.mxu1 %v378_v53  ;;  %v414_v3 = vld [vmem:[%s1083_s10 + $0xe8] sm:$0xff]  ;;  %v367_v4 = vld [vmem:[%s1077_s30 + $0x70] sm:$0xff]  ;;  %v368_v5 = vld [vmem:[%s1077_s30 + $0x78] sm:$0xff] }
 0x14c   : > { %492 = vmatpush.msra.mxu3 %v416_v62  ;;  %470 = vmatpush.msra.mxu2 %v399_v0  ;;  %v397_v6 = vld [vmem:[%s1083_s10 + $0x60] sm:$0xff]  ;;  %v366_v9 = vld [vmem:[%s1077_s30 + $0x68] sm:$0xff]  ;;  %v396_v10 = vld [vmem:[%s1083_s10 + $0x58] sm:$0xff] }
 0x14d   : > { %423 = vmatpush.msra.mxu0 %v375_v54  ;;  %446 = vmatpush.msra.mxu1 %v376_v55  ;;  %v413_v7 = vld [vmem:[%s1083_s10 + $0xe0] sm:$0xff]  ;;  %v412_v11 = vld [vmem:[%s1083_s10 + $0xd8] sm:$0xff]  ;;  %v363_v12 = vld [vmem:[%s1077_s30 + $0x50] sm:$0xff] }
 0x14e   : > { %493 = vmatpush.msra.mxu3 %v415_v1  ;;  %v365_v8 = vld [vmem:[%s1077_s30 + $0x60] sm:$0xff]  ;;  %471 = vmatpush.msra.mxu2 %v398_v2  ;;  %v364_v13 = vld [vmem:[%s1077_s30 + $0x58] sm:$0xff]  ;;  %v395_v14 = vld [vmem:[%s1083_s10 + $0x50] sm:$0xff] }
 0x14f   : > { %424 = vmatpush.msra.mxu0 %v373_v56  ;;  %447 = vmatpush.msra.mxu1 %v374_v57  ;;  %v411_v15 = vld [vmem:[%s1083_s10 + $0xd0] sm:$0xff]  ;;  %v361_v16 = vld [vmem:[%s1077_s30 + $0x40] sm:$0xff]  ;;  %v362_v17 = vld [vmem:[%s1077_s30 + $0x48] sm:$0xff] }
 0x150   : > { %494 = vmatpush.msra.mxu3 %v414_v3  ;;  %472 = vmatpush.msra.mxu2 %v397_v6  ;;  %v394_v18 = vld [vmem:[%s1083_s10 + $0x48] sm:$0xff]  ;;  %v359_v20 = vld [vmem:[%s1077_s30 + $0x30] sm:$0xff]  ;;  %v360_v21 = vld [vmem:[%s1077_s30 + $0x38] sm:$0xff] }
 0x151   : > { %425 = vmatpush.msra.mxu0 %v371_v58  ;;  %448 = vmatpush.msra.mxu1 %v372_v59  ;;  %v410_v19 = vld [vmem:[%s1083_s10 + $0xc8] sm:$0xff]  ;;  %v393_v22 = vld [vmem:[%s1083_s10 + $0x40] sm:$0xff]  ;;  %v392_v26 = vld [vmem:[%s1083_s10 + $0x38] sm:$0xff] }
 0x152   : > { %495 = vmatpush.msra.mxu3 %v413_v7  ;;  %473 = vmatpush.msra.mxu2 %v396_v10  ;;  %v409_v23 = vld [vmem:[%s1083_s10 + $0xc0] sm:$0xff]  ;;  %v358_v25 = vld [vmem:[%s1077_s30 + $0x28] sm:$0xff]  ;;  %v408_v27 = vld [vmem:[%s1083_s10 + $0xb8] sm:$0xff] }
 0x153   : > { %426 = vmatpush.msra.mxu0 %v369_v60  ;;  %449 = vmatpush.msra.mxu1 %v370_v63  ;;  %v357_v24 = vld [vmem:[%s1077_s30 + $0x20] sm:$0xff]  ;;  %v355_v28 = vld [vmem:[%s1077_s30 + $0x10] sm:$0xff]  ;;  %v356_v29 = vld [vmem:[%s1077_s30 + $0x18] sm:$0xff] }
 0x154   : > { %496 = vmatpush.msra.mxu3 %v412_v11  ;;  %474 = vmatpush.msra.mxu2 %v395_v14  ;;  %v391_v30 = vld [vmem:[%s1083_s10 + $0x30] sm:$0xff]  ;;  %v353_v32 = vld [vmem:[%s1077_s30] sm:$0xff]  ;;  %v354_v33 = vld [vmem:[%s1077_s30 + $0x8] sm:$0xff] }
 0x155   : > { %427 = vmatpush.msra.mxu0 %v367_v4  ;;  %450 = vmatpush.msra.mxu1 %v368_v5  ;;  %v407_v31 = vld [vmem:[%s1083_s10 + $0xb0] sm:$0xff]  ;;  %v417_v34 = vld [vmem:[#allocation2] sm:$0xff]  ;;  %v390_v35 = vld [vmem:[%s1083_s10 + $0x28] sm:$0xff] }
 0x156   : > { %497 = vmatpush.msra.mxu3 %v411_v15  ;;  %475 = vmatpush.msra.mxu2 %v394_v18  ;;  %v406_v36 = vld [vmem:[%s1083_s10 + $0xa8] sm:$0xff]  ;;  %v389_v37 = vld [vmem:[%s1083_s10 + $0x20] sm:$0xff]  ;;  %v388_v39 = vld [vmem:[%s1083_s10 + $0x18] sm:$0xff] }
 0x157   : > { %428 = vmatpush.msra.mxu0 %v365_v8  ;;  %451 = vmatpush.msra.mxu1 %v366_v9  ;;  %v405_v38 = vld [vmem:[%s1083_s10 + $0xa0] sm:$0xff]  ;;  %v404_v40 = vld [vmem:[%s1083_s10 + $0x98] sm:$0xff]  ;;  %v387_v41 = vld [vmem:[%s1083_s10 + $0x10] sm:$0xff] }
 0x158   : > { %498 = vmatpush.msra.mxu3 %v410_v19  ;;  %476 = vmatpush.msra.mxu2 %v393_v22  ;;  %v403_v42 = vld [vmem:[%s1083_s10 + $0x90] sm:$0xff]  ;;  %v418_v43 = vld [vmem:[#allocation2 + $0x8] sm:$0xff]  ;;  %v385_v46 = vld [vmem:[%s1083_s10] sm:$0xff] }
 0x159   : > { %429 = vmatpush.msra.mxu0 %v363_v12  ;;  %452 = vmatpush.msra.mxu1 %v364_v13  ;;  %v386_v44 = vld [vmem:[%s1083_s10 + $0x8] sm:$0xff]  ;;  %v401_v47 = vld [vmem:[%s1083_s10 + $0x80] sm:$0xff] }
 0x15a   : > { %499 = vmatpush.msra.mxu3 %v409_v23  ;;  %477 = vmatpush.msra.mxu2 %v392_v26  ;;  %v402_v45 = vld [vmem:[%s1083_s10 + $0x88] sm:$0xff] }
 0x15b   : > { %430 = vmatpush.msra.mxu0 %v361_v16  ;;  %453 = vmatpush.msra.mxu1 %v362_v17 }
 0x15c   : > { %500 = vmatpush.msra.mxu3 %v408_v27  ;;  %478 = vmatpush.msra.mxu2 %v391_v30 }
 0x15d   : > { %431 = vmatpush.msra.mxu0 %v359_v20  ;;  %454 = vmatpush.msra.mxu1 %v360_v21 }
 0x15e   : > { %501 = vmatpush.msra.mxu3 %v407_v31  ;;  %479 = vmatpush.msra.mxu2 %v390_v35 }
 0x15f   : > { %432 = vmatpush.msra.mxu0 %v357_v24  ;;  %455 = vmatpush.msra.mxu1 %v358_v25 }
 0x160   : > { %502 = vmatpush.msra.mxu3 %v406_v36  ;;  %480 = vmatpush.msra.mxu2 %v389_v37 }
 0x161   : > { %433 = vmatpush.msra.mxu0 %v355_v28  ;;  %456 = vmatpush.msra.mxu1 %v356_v29 }
 0x162   : > { %503 = vmatpush.msra.mxu3 %v405_v38  ;;  %481 = vmatpush.msra.mxu2 %v388_v39 }
 0x163   : > { %434 = vmatpush.msra.mxu0 %v353_v32  ;;  %457 = vmatpush.msra.mxu1 %v354_v33 }
 0x164   : > { %435 = vmatmul.f32.vlgmr.msra.gmra.mxu0 %v417_v34  ;;  %458 = vmatmul.f32.vlgmr.msra.gmra.mxu1 %v417_v34 }
 0x165   : > { %504 = vmatpush.msra.mxu3 %v404_v40  ;;  %482 = vmatpush.msra.mxu2 %v387_v41 }
 0x167   : > { %505 = vmatpush.msra.mxu3 %v403_v42  ;;  %483 = vmatpush.msra.mxu2 %v386_v44 }
 0x169   : > { %506 = vmatpush.msra.mxu3 %v402_v45  ;;  %484 = vmatpush.msra.mxu2 %v385_v46 }
 0x16b   : > { %507 = vmatpush.msra.mxu3 %v401_v47 }
 0x16c   : > { %438 = vmatmul.f32.gmra.mxu0 %v418_v43  ;;  %461 = vmatmul.f32.gmra.mxu1 %v418_v43 }
 0x1e1   : > { %v436_v48 = vpop.f32.mrf.mxu0  ;;  %v459_v49 = vpop.f32.mrf.mxu1 }
 0x1e2   : > { %v465_v50 = vmax.f32 %v436_v48, 0.0  ;;  %v466_v51 = vmax.f32 %v459_v49, 0.0 }
 0x1e4   : > { %485 = vmatmul.f32.vlgmr.msra.gmra.mxu2 %v465_v50  ;;  %508 = vmatmul.f32.vlgmr.msra.gmra.mxu3 %v466_v51 }
 0x1e9   : > { %v439_v52 = vpop.f32.mrf.mxu0  ;;  %v462_v53 = vpop.f32.mrf.mxu1 }
 0x1ea   : > { %v467_v54 = vmax.f32 %v439_v52, 0.0  ;;  %v468_v55 = vmax.f32 %v462_v53, 0.0 }
 0x1ec   : > { %488 = vmatmul.f32.gmra.mxu2 %v467_v54  ;;  %511 = vmatmul.f32.gmra.mxu3 %v468_v55 }
 0x267   : > { %v486_v56 = vpop.f32.mrf.mxu2  ;;  %v509_v57 = vpop.f32.mrf.mxu3 }
 0x268   : > { %v510_v58 = vadd.f32 %v509_v57, %v486_v56 }
 0x26c   : > { %517 = sbr.rel (%p653_p1) target bundleno = 627 (0x273), region = 56 }
 0x26f   : > { %v489_v59 = vpop.f32.mrf.mxu2  ;;  %v512_v60 = vpop.f32.mrf.mxu3 }
 0x270   : > { %v513_v61 = vadd.f32 %v512_v60, %v489_v59 }
 0x271   : > { %518 = vst [vmem:[#allocation9] sm:$0xff] %v510_v58 }
 0x272   : > { %519 = vst [vmem:[#allocation9 + $0x8] sm:$0xff] %v513_v61 }
 0x273 PF: > { %p655_p2 = scmp.le.s32.totalorder %s922_s18, 0 }
 0x275   : > { %523 = sbr.rel (%p655_p2) target bundleno = 639 (0x27f), region = 60 }
 0x27a   : > { %v524_v62 = vld [vmem:[#allocation9] sm:$0xff]  ;;  %v525_v63 = vld [vmem:[#allocation9 + $0x8] sm:$0xff] }
 0x27b   : > { %v526_v0 = vadd.f32 %v524_v62, %v510_v58  ;;  %v527_v1 = vadd.f32 %v525_v63, %v513_v61 }
 0x27d   : > { %528 = vst [vmem:[#allocation9] sm:$0xff] %v526_v0 }
 0x27e   : > { %529 = vst [vmem:[#allocation9 + $0x8] sm:$0xff] %v527_v1 }
 0x27f PF: > { %p688_p3 = scmp.eq.s32.totalorder %s1037_s22, 3  ;;  %s540_s6 = sshll.u32 %s1184_s4, 4  ;;  %s541_s6 = int_to_ptr.hbm [resolvable:$true] %s540_s6 }
 0x280   : > { %s939_s7 = smov [#allocation9]   ;;  %s940_s9 = smov 128  }
 0x281   : > { %s538_s8 = sshll.u32 %s939_s7, 4  ;;  %s941_s18 = smov 8   ;;  %s539_s8 = int_to_ptr.vmem [resolvable:$true] %s538_s8 }
 0x282   : > { %671 = dma.vmem_to_hbm [thread:$0]  (%p688_p3), %s539_s8, 256, %s541_s6, [#allocation5], %s940_s9, %s940_s9, %s941_s18  }
 0x283   : > { %905 = dma.done.wait (%p688_p3), [#allocation5], 256  }
 0x284   : > { %907 = vsyncadd (%p688_p3), [#allocation5], 4294967040 }
 0x285 PF: > { %s19_s20 = sadd.s32 1, %s930_s20   ;;  %s1189_s15 = smov %s914_s16 }
 0x286   : > { %p16_p4 = scmp.ge.s32.totalorder %s19_s20, 6   ;;  %s1190_s16 = smov %s918_s17 }
 0x287   : > { %s1191_s17 = smov %s1015_s28  ;;  %s1192_s18 = smov %s926_s19 }
 0x288   : > { %s1193_s19 = smov %s1195_s21  ;;  %18 = sbr.rel (!%p16_p4) target bundleno = 6 (0x6), region = 103 }
 0x28d   :  { %557 = vsyncpa [#allocation4], 1 }
 0x28e   :  { %559 = vsyncpa [#allocation4 + $0x1], 1 }
 0x28f   :  { %560 = vsyncpa [#allocation7], 1 }
 0x290   :  { %562 = vsyncpa [#allocation7 + $0x1], 1 }
 0x291   :  { %563 = vsyncpa [#allocation5], 1 }
 0x292   :  { %565 = vsyncpa [#allocation5 + $0x1], 1 }

</bundles_post_ra>
